<compile_context>
chip_gen: v6e
topology: v6e:2x2x1
jax: 0.10.0
libtpu: 0.0.40
codegen_flags: <defaults>
</compile_context>

<pallas_src>
import functools

import jax
import jax.numpy as jnp
from jax.experimental import pallas as pl
from jax.experimental.pallas import tpu as pltpu


MXU_DTYPE = jnp.bfloat16   # native MXU input dtype; accumulation / BN math stay f32


def _vmem_limit_bytes():
    # Budget ~75% of physical VMEM (headroom for compiler-internal scratch):
    # ~48 MiB on v7x (64 MiB phys), ~96 MiB on v5e/v6e (128 MiB phys).
    try:
        cap = pltpu.get_tpu_info().vmem_capacity_bytes
    except Exception:
        cap = 64 * 1024 * 1024   # conservative fallback = v7x physical
    return int(cap) * 3 // 4


def _const_spec(shape):
    # Constant-index operand: stays VMEM-resident, single-buffered (no wasted 2nd buffer).
    return pl.BlockSpec(shape, lambda bt: (0, 0), pipeline_mode=pl.Buffered(1))


def _stats_kernel(x_ref, w1_ref, gamma_ref, beta_ref,
                  h_ref, scale_ref, shift_ref,
                  sum_ref, sumsq_ref, *, true_b, eps):
    bt = pl.program_id(0)

    @pl.when(bt == 0)
    def _init():
        sum_ref[...] = jnp.zeros_like(sum_ref)
        sumsq_ref[...] = jnp.zeros_like(sumsq_ref)

    # First Linear on the MXU (bf16 in, f32 accumulate). b1 is omitted: training-mode
    # BatchNorm subtracts the batch mean, which cancels any constant per-feature bias.
    h = jnp.dot(x_ref[...], w1_ref[...], preferred_element_type=jnp.float32)

    # One-pass batch statistics in f32 accumulators (zero-padded rows contribute 0).
    # TODO(synk): switch to a shifted/Welford accumulation if activations ever have
    # |mean| >> std (catastrophic cancellation risk in E[h^2] - mean^2).
    sum_ref[...] += jnp.sum(h, axis=0, keepdims=True)
    sumsq_ref[...] += jnp.sum(h * h, axis=0, keepdims=True)

    # Stash h for the apply pass: no recompute of x @ W1 and no second read of x.
    h_ref[...] = h.astype(h_ref.dtype)

    @pl.when(bt == pl.num_programs(0) - 1)
    def _finalize():
        inv_b = 1.0 / float(true_b)
        mean = sum_ref[...] * inv_b
        var = jnp.maximum(sumsq_ref[...] * inv_b - mean * mean, 0.0)
        scale = gamma_ref[...].astype(jnp.float32) * jax.lax.rsqrt(var + eps)
        scale_ref[...] = scale
        shift_ref[...] = beta_ref[...].astype(jnp.float32) - mean * scale


def _apply_kernel(h_ref, scale_ref, shift_ref, w2_ref, b2_ref, o_ref):
    # Fused BN affine + ReLU on the VPU, then second Linear on the MXU + bias.
    y = jnp.maximum(
        h_ref[...].astype(jnp.float32) * scale_ref[...] + shift_ref[...], 0.0)
    out = jnp.dot(y.astype(w2_ref.dtype), w2_ref[...],
                  preferred_element_type=jnp.float32)
    o_ref[...] = (out + b2_ref[...].astype(jnp.float32)).astype(o_ref.dtype)


def projection_mlp(x, w1, b1, gamma, beta, w2, b2, *, block_b=512, eps=1e-5):
    # b1 is a no-op under training-mode BatchNorm (batch-mean subtraction cancels it);
    # accepted for API parity, never DMA'd to the device.
    del b1

    B, d_in = x.shape
    H = w1.shape[1]
    d_out = w2.shape[1]
    out_dtype = x.dtype

    # Big batch tiles amortize per-grid-step overhead / weight loads and keep HBM
    # streaming near roofline; clamp so tiny batches aren't massively over-padded.
    block_b = max(8, min(block_b, pl.next_power_of_2(max(B, 8))))
    b_pad = pl.cdiv(B, block_b) * block_b
    if b_pad != B:
        # Zero rows contribute exactly 0 to the stats (b1 dropped); stats divide by the
        # true B, and padded output rows are sliced away at the end.
        x = jnp.pad(x, ((0, b_pad - B), (0, 0)))
    n_bt = b_pad // block_b

    # Feed the MXU bf16 (inputs only; accumulation and BN math stay f32).
    x_mx = x.astype(MXU_DTYPE)
    w1_mx = w1.astype(MXU_DTYPE)
    w2_mx = w2.astype(MXU_DTYPE)
    gamma2 = gamma.reshape(1, H).astype(jnp.float32)
    beta2 = beta.reshape(1, H).astype(jnp.float32)
    b2_2 = b2.reshape(1, d_out).astype(jnp.float32)

    vmem_limit = _vmem_limit_bytes()
    isz = jnp.dtype(MXU_DTYPE).itemsize
    osz = jnp.dtype(out_dtype).itemsize

    # ---------- Pass 1: h = x @ W1 (stashed bf16 to HBM) + batch stats -> scale/shift.
    stats_kernel = functools.partial(_stats_kernel, true_b=B, eps=eps)
    stats_cost = pl.CostEstimate(
        flops=2 * b_pad * d_in * H,
        transcendentals=H,
        bytes_accessed=(b_pad * d_in * isz        # x read once
                        + d_in * H * isz          # W1
                        + 2 * H * 4               # gamma, beta
                        + b_pad * H * isz         # h write
                        + 2 * H * 4))             # scale, shift write
    h, scale, shift = pl.pallas_call(
        stats_kernel,
        out_shape=(jax.ShapeDtypeStruct((b_pad, H), MXU_DTYPE),
                   jax.ShapeDtypeStruct((1, H), jnp.float32),
                   jax.ShapeDtypeStruct((1, H), jnp.float32)),
        grid_spec=pltpu.PrefetchScalarGridSpec(
            num_scalar_prefetch=0,
            grid=(n_bt,),
            in_specs=[
                pl.BlockSpec((block_b, d_in), lambda bt: (bt, 0)),   # x tile (streamed)
                _const_spec((d_in, H)),                              # W1 (resident)
                _const_spec((1, H)),                                 # gamma
                _const_spec((1, H)),                                 # beta
            ],
            out_specs=[
                pl.BlockSpec((block_b, H), lambda bt: (bt, 0)),      # h tile (streamed)
                pl.BlockSpec((1, H), lambda bt: (0, 0)),             # scale (final write)
                pl.BlockSpec((1, H), lambda bt: (0, 0)),             # shift (final write)
            ],
            scratch_shapes=[
                pltpu.VMEM((1, H), jnp.float32),   # sum(h)
                pltpu.VMEM((1, H), jnp.float32),   # sum(h*h)
            ],
        ),
        compiler_params=pltpu.CompilerParams(
            dimension_semantics=("arbitrary",),    # batch axis is a reduction here
            vmem_limit_bytes=vmem_limit,
        ),
        cost_estimate=stats_cost,
    )(x_mx, w1_mx, gamma2, beta2)

    # ---------- Pass 2: out = relu(h * scale + shift) @ W2 + b2 (fully parallel).
    # NOTE: d_out=128 only half-fills the 256-wide MXU on v6e/v7x; acceptable since the
    # first matmul dominates FLOPs (pad/pack d_out if the surrounding model allows).
    apply_cost = pl.CostEstimate(
        flops=2 * b_pad * H * d_out + 3 * b_pad * H,
        transcendentals=0,
        bytes_accessed=(b_pad * H * isz           # h read
                        + 2 * H * 4               # scale, shift
                        + H * d_out * isz         # W2
                        + d_out * 4               # b2
                        + b_pad * d_out * osz))   # output write
    out = pl.pallas_call(
        _apply_kernel,
        out_shape=jax.ShapeDtypeStruct((b_pad, d_out), out_dtype),
        grid_spec=pltpu.PrefetchScalarGridSpec(
            num_scalar_prefetch=0,
            grid=(n_bt,),
            in_specs=[
                pl.BlockSpec((block_b, H), lambda bt: (bt, 0)),      # h tile (streamed)
                _const_spec((1, H)),                                 # scale
                _const_spec((1, H)),                                 # shift
                _const_spec((H, d_out)),                             # W2 (resident)
                _const_spec((1, d_out)),                             # b2
            ],
            out_specs=pl.BlockSpec((block_b, d_out), lambda bt: (bt, 0)),
        ),
        compiler_params=pltpu.CompilerParams(
            dimension_semantics=("parallel",),     # independent tiles -> 2nd TC on v7x
            vmem_limit_bytes=vmem_limit,
        ),
        cost_estimate=apply_cost,
    )(h, scale, shift, w2_mx, b2_2)

    return out[:B]


def projection_mlp_ref(x, w1, b1, gamma, beta, w2, b2, eps=1e-5, mxu_dtype=MXU_DTYPE):
    # Pure-JAX reference mirroring the kernel's numerics (bf16 MXU inputs, f32
    # accumulation, training-mode BatchNorm). b1 is kept here to demonstrate that the
    # batch-mean subtraction cancels it exactly.
    h = jnp.dot(x.astype(mxu_dtype), w1.astype(mxu_dtype),
                preferred_element_type=jnp.float32) + b1
    mean = jnp.mean(h, axis=0, keepdims=True)
    var = jnp.mean((h - mean) ** 2, axis=0, keepdims=True)
    h = (h - mean) / jnp.sqrt(var + eps) * gamma + beta
    h = jnp.maximum(h, 0.0)
    return jnp.dot(h.astype(mxu_dtype), w2.astype(mxu_dtype),
                   preferred_element_type=jnp.float32) + b2


if __name__ == "__main__":
    # Small, lane-friendly shapes consistent with ProjectionMLP(input_dim, hidden, out).
    # B=200 is deliberately not a multiple of the batch tile (exercises zero-padding),
    # and block_b=128 here forces a multi-tile stats reduction (production default: 512).
    B, D_IN, H, D_OUT = 200, 256, 256, 128

    key = jax.random.PRNGKey(0)
    kx, kw1, kb1, kw2, kb2 = jax.random.split(key, 5)

    x = jax.random.normal(kx, (B, D_IN), dtype=jnp.float32)
    w1 = jax.random.uniform(kw1, (D_IN, H), minval=-1.0 / jnp.sqrt(D_IN),
                            maxval=1.0 / jnp.sqrt(D_IN), dtype=jnp.float32)
    b1 = jax.random.uniform(kb1, (H,), minval=-1.0 / jnp.sqrt(D_IN),
                            maxval=1.0 / jnp.sqrt(D_IN), dtype=jnp.float32)
    gamma = jnp.ones((H,), dtype=jnp.float32)    # BatchNorm1d weight init
    beta = jnp.zeros((H,), dtype=jnp.float32)    # BatchNorm1d bias init
    w2 = jax.random.uniform(kw2, (H, D_OUT), minval=-1.0 / jnp.sqrt(H),
                            maxval=1.0 / jnp.sqrt(H), dtype=jnp.float32)
    b2 = jax.random.uniform(kb2, (D_OUT,), minval=-1.0 / jnp.sqrt(H),
                            maxval=1.0 / jnp.sqrt(H), dtype=jnp.float32)

    out = projection_mlp(x, w1, b1, gamma, beta, w2, b2, block_b=128)
    out = jax.block_until_ready(out)

    ref = projection_mlp_ref(x, w1, b1, gamma, beta, w2, b2)
    assert out.shape == (B, D_OUT)
    assert jnp.allclose(out, ref, atol=2e-2, rtol=2e-2), "mismatch vs reference"

    print("KERNEL_OK")
</pallas_src>

<mosaic_0001>
module attributes {stable_mosaic.version = 11 : i64} {
  func.func @_stats_kernel(%arg0: i32, %arg1: memref<128x256xbf16, #tpu.memory_space<vmem>>, %arg2: memref<256x256xbf16, #tpu.memory_space<vmem>>, %arg3: memref<1x256xf32, #tpu.memory_space<vmem>>, %arg4: memref<1x256xf32, #tpu.memory_space<vmem>>, %arg5: memref<128x256xbf16, #tpu.memory_space<vmem>>, %arg6: memref<1x256xf32, #tpu.memory_space<vmem>>, %arg7: memref<1x256xf32, #tpu.memory_space<vmem>>, %arg8: memref<1x256xf32, #tpu.memory_space<vmem>>, %arg9: memref<1x256xf32, #tpu.memory_space<vmem>>) attributes {dimension_semantics = [#tpu.dimension_semantics<arbitrary>], iteration_bounds = array<i64: 2>, scalar_prefetch = 0 : i64, scratch_operands = 2 : i64, tpu.core_type = #tpu.core_type<tc>, window_params = [{transform_indices = @transform_0, window_bounds = array<i64: 128, 256>}, {pipeline_mode = #tpu.pipeline_mode<synchronous>, transform_indices = @transform_1, window_bounds = array<i64: 256, 256>}, {pipeline_mode = #tpu.pipeline_mode<synchronous>, transform_indices = @transform_2, window_bounds = array<i64: 1, 256>}, {pipeline_mode = #tpu.pipeline_mode<synchronous>, transform_indices = @transform_3, window_bounds = array<i64: 1, 256>}, {transform_indices = @transform_4, window_bounds = array<i64: 128, 256>}, {pipeline_mode = #tpu.pipeline_mode<synchronous>, transform_indices = @transform_5, window_bounds = array<i64: 1, 256>}, {pipeline_mode = #tpu.pipeline_mode<synchronous>, transform_indices = @transform_6, window_bounds = array<i64: 1, 256>}]} {
    %c0_i32 = arith.constant 0 : i32
    %0 = arith.cmpi eq, %arg0, %c0_i32 : i32
    %1 = arith.extui %0 : i1 to i32
    %c0_i32_0 = arith.constant 0 : i32
    %2 = arith.cmpi ne, %1, %c0_i32_0 : i32
    scf.if %2 {
      %cst_17 = arith.constant 0.000000e+00 : f32
      %22 = vector.broadcast %cst_17 : f32 to vector<1x256xf32>
      %c0_18 = arith.constant 0 : index
      %c0_19 = arith.constant 0 : index
      %23 = vector.load %arg8[%c0_18, %c0_19] : memref<1x256xf32, #tpu.memory_space<vmem>>, vector<1x256xf32>
      tpu.vector_store %arg8[%c0_18, %c0_19], %22 {strides = array<i32>} : memref<1x256xf32, #tpu.memory_space<vmem>>, vector<1x256xf32>,
      %cst_20 = arith.constant 0.000000e+00 : f32
      %24 = vector.broadcast %cst_20 : f32 to vector<1x256xf32>
      %c0_21 = arith.constant 0 : index
      %c0_22 = arith.constant 0 : index
      %25 = vector.load %arg9[%c0_21, %c0_22] : memref<1x256xf32, #tpu.memory_space<vmem>>, vector<1x256xf32>
      tpu.vector_store %arg9[%c0_21, %c0_22], %24 {strides = array<i32>} : memref<1x256xf32, #tpu.memory_space<vmem>>, vector<1x256xf32>,
    } else {
    }
    %c0 = arith.constant 0 : index
    %c0_1 = arith.constant 0 : index
    %3 = vector.load %arg1[%c0, %c0_1] : memref<128x256xbf16, #tpu.memory_space<vmem>>, vector<128x256xbf16>
    %c0_2 = arith.constant 0 : index
    %c0_3 = arith.constant 0 : index
    %4 = vector.load %arg2[%c0_2, %c0_3] : memref<256x256xbf16, #tpu.memory_space<vmem>>, vector<256x256xbf16>
    %cst = arith.constant dense<0.000000e+00> : vector<128x256xf32>
    %5 = tpu.matmul %3, %4, %cst {dimension_numbers = #tpu.dot_dimension_numbers<[1], [0], [0], [1], [0, 0, 1, 1], [], []>} : vector<128x256xbf16>, vector<256x256xbf16>, vector<128x256xf32> -> vector<128x256xf32>
    %c0_4 = arith.constant 0 : index
    %c0_5 = arith.constant 0 : index
    %6 = vector.load %arg8[%c0_4, %c0_5] : memref<1x256xf32, #tpu.memory_space<vmem>>, vector<1x256xf32>
    %cst_6 = arith.constant dense<0.000000e+00> : vector<256xf32>
    %7 = vector.multi_reduction <add>, %5, %cst_6 [0] : vector<128x256xf32> to vector<256xf32>
    %8 = vector.shape_cast %7 : vector<256xf32> to vector<1x256xf32>
    %9 = arith.addf %6, %8 : vector<1x256xf32>
    %c0_7 = arith.constant 0 : index
    %c0_8 = arith.constant 0 : index
    %10 = vector.load %arg8[%c0_7, %c0_8] : memref<1x256xf32, #tpu.memory_space<vmem>>, vector<1x256xf32>
    tpu.vector_store %arg8[%c0_7, %c0_8], %9 {strides = array<i32>} : memref<1x256xf32, #tpu.memory_space<vmem>>, vector<1x256xf32>,
    %c0_9 = arith.constant 0 : index
    %c0_10 = arith.constant 0 : index
    %11 = vector.load %arg9[%c0_9, %c0_10] : memref<1x256xf32, #tpu.memory_space<vmem>>, vector<1x256xf32>
    %12 = arith.mulf %5, %5 : vector<128x256xf32>
    %cst_11 = arith.constant dense<0.000000e+00> : vector<256xf32>
    %13 = vector.multi_reduction <add>, %12, %cst_11 [0] : vector<128x256xf32> to vector<256xf32>
    %14 = vector.shape_cast %13 : vector<256xf32> to vector<1x256xf32>
    %15 = arith.addf %11, %14 : vector<1x256xf32>
    %c0_12 = arith.constant 0 : index
    %c0_13 = arith.constant 0 : index
    %16 = vector.load %arg9[%c0_12, %c0_13] : memref<1x256xf32, #tpu.memory_space<vmem>>, vector<1x256xf32>
    tpu.vector_store %arg9[%c0_12, %c0_13], %15 {strides = array<i32>} : memref<1x256xf32, #tpu.memory_space<vmem>>, vector<1x256xf32>,
    %17 = arith.truncf %5 : vector<128x256xf32> to vector<128x256xbf16>
    %c0_14 = arith.constant 0 : index
    %c0_15 = arith.constant 0 : index
    %18 = vector.load %arg5[%c0_14, %c0_15] : memref<128x256xbf16, #tpu.memory_space<vmem>>, vector<128x256xbf16>
    tpu.vector_store %arg5[%c0_14, %c0_15], %17 {strides = array<i32>} : memref<128x256xbf16, #tpu.memory_space<vmem>>, vector<128x256xbf16>,
    %c1_i32 = arith.constant 1 : i32
    %19 = arith.cmpi eq, %arg0, %c1_i32 : i32
    %20 = arith.extui %19 : i1 to i32
    %c0_i32_16 = arith.constant 0 : i32
    %21 = arith.cmpi ne, %20, %c0_i32_16 : i32
    scf.if %21 {
      %c0_17 = arith.constant 0 : index
      %c0_18 = arith.constant 0 : index
      %22 = vector.load %arg8[%c0_17, %c0_18] : memref<1x256xf32, #tpu.memory_space<vmem>>, vector<1x256xf32>
      %cst_19 = arith.constant 5.000000e-03 : f32
      %23 = vector.broadcast %cst_19 : f32 to vector<1x256xf32>
      %24 = arith.mulf %22, %23 : vector<1x256xf32>
      %c0_20 = arith.constant 0 : index
      %c0_21 = arith.constant 0 : index
      %25 = vector.load %arg9[%c0_20, %c0_21] : memref<1x256xf32, #tpu.memory_space<vmem>>, vector<1x256xf32>
      %cst_22 = arith.constant 5.000000e-03 : f32
      %26 = vector.broadcast %cst_22 : f32 to vector<1x256xf32>
      %27 = arith.mulf %25, %26 : vector<1x256xf32>
      %28 = arith.mulf %24, %24 : vector<1x256xf32>
      %29 = arith.subf %27, %28 : vector<1x256xf32>
      %cst_23 = arith.constant 0.000000e+00 : f32
      %30 = vector.broadcast %cst_23 : f32 to vector<1x256xf32>
      %31 = arith.maximumf %29, %30 : vector<1x256xf32>
      %c0_24 = arith.constant 0 : index
      %c0_25 = arith.constant 0 : index
      %32 = vector.load %arg3[%c0_24, %c0_25] : memref<1x256xf32, #tpu.memory_space<vmem>>, vector<1x256xf32>
      %cst_26 = arith.constant 9.99999974E-6 : f32
      %33 = vector.broadcast %cst_26 : f32 to vector<1x256xf32>
      %34 = arith.addf %31, %33 : vector<1x256xf32>
      %35 = math.rsqrt %34 : vector<1x256xf32>
      %36 = arith.mulf %32, %35 : vector<1x256xf32>
      %c0_27 = arith.constant 0 : index
      %c0_28 = arith.constant 0 : index
      %37 = vector.load %arg6[%c0_27, %c0_28] : memref<1x256xf32, #tpu.memory_space<vmem>>, vector<1x256xf32>
      tpu.vector_store %arg6[%c0_27, %c0_28], %36 {strides = array<i32>} : memref<1x256xf32, #tpu.memory_space<vmem>>, vector<1x256xf32>,
      %c0_29 = arith.constant 0 : index
      %c0_30 = arith.constant 0 : index
      %38 = vector.load %arg4[%c0_29, %c0_30] : memref<1x256xf32, #tpu.memory_space<vmem>>, vector<1x256xf32>
      %39 = arith.mulf %24, %36 : vector<1x256xf32>
      %40 = arith.subf %38, %39 : vector<1x256xf32>
      %c0_31 = arith.constant 0 : index
      %c0_32 = arith.constant 0 : index
      %41 = vector.load %arg7[%c0_31, %c0_32] : memref<1x256xf32, #tpu.memory_space<vmem>>, vector<1x256xf32>
      tpu.vector_store %arg7[%c0_31, %c0_32], %40 {strides = array<i32>} : memref<1x256xf32, #tpu.memory_space<vmem>>, vector<1x256xf32>,
    } else {
    }
    return
  }
  func.func @transform_0(%arg0: i32) -> (i32, i32) {
    %c0_i32 = arith.constant 0 : i32
    %c0_i32_0 = arith.constant 0 : i32
    return %arg0, %c0_i32 : i32, i32
  }
  func.func @transform_1(%arg0: i32) -> (i32, i32) {
    %c0_i32 = arith.constant 0 : i32
    %c0_i32_0 = arith.constant 0 : i32
    %c0_i32_1 = arith.constant 0 : i32
    return %c0_i32, %c0_i32_0 : i32, i32
  }
  func.func @transform_2(%arg0: i32) -> (i32, i32) {
    %c0_i32 = arith.constant 0 : i32
    %c0_i32_0 = arith.constant 0 : i32
    %c0_i32_1 = arith.constant 0 : i32
    return %c0_i32, %c0_i32_0 : i32, i32
  }
  func.func @transform_3(%arg0: i32) -> (i32, i32) {
    %c0_i32 = arith.constant 0 : i32
    %c0_i32_0 = arith.constant 0 : i32
    %c0_i32_1 = arith.constant 0 : i32
    return %c0_i32, %c0_i32_0 : i32, i32
  }
  func.func @transform_4(%arg0: i32) -> (i32, i32) {
    %c0_i32 = arith.constant 0 : i32
    %c0_i32_0 = arith.constant 0 : i32
    return %arg0, %c0_i32 : i32, i32
  }
  func.func @transform_5(%arg0: i32) -> (i32, i32) {
    %c0_i32 = arith.constant 0 : i32
    %c0_i32_0 = arith.constant 0 : i32
    %c0_i32_1 = arith.constant 0 : i32
    return %c0_i32, %c0_i32_0 : i32, i32
  }
  func.func @transform_6(%arg0: i32) -> (i32, i32) {
    %c0_i32 = arith.constant 0 : i32
    %c0_i32_0 = arith.constant 0 : i32
    %c0_i32_1 = arith.constant 0 : i32
    return %c0_i32, %c0_i32_0 : i32, i32
  }
}

</mosaic_0001>

<bundles_post_ra>
// kernel: tpu_custom_call.1
= control target key start
LH: loop header
LB: loop body
LE: loop exit
PB: predicated region body
PF: predicated region fallthrough
CT: control target
= control target key end

     0   :  { %12 = vsyncpa [#allocation5], 0  ;;  %s1987_s0 = inlined_call_operand.hbm [shape: bf16[256,256], index: 0, kind: input, shape index: {}]   ;;  %s1988_s1 = inlined_call_operand.hbm [shape: bf16[256,256], index: 1, kind: input, shape index: {}]   ;;  %s1989_s2 = inlined_call_operand.vmem [shape: f32[1,256], index: 2, kind: input, shape index: {}]   ;;  %s1990_s3 = inlined_call_operand.vmem [shape: f32[1,256], index: 3, kind: input, shape index: {}]   ;;  %s1991_s4 = inlined_call_operand.hbm [shape: bf16[256,256], index: 4, kind: output, shape index: {0}]   ;;  %s1992_s5 = inlined_call_operand.hbm [shape: f32[1,256], index: 5, kind: output, shape index: {1}]   ;;  %s1993_s6 = inlined_call_operand.hbm [shape: f32[1,256], index: 6, kind: output, shape index: {2}]  }
   0x1   :  { %14 = vsyncpa [#allocation5 + $0x1], 0 }
   0x2   :  { %15 = vsyncpa [#allocation8], 0 }
   0x3   :  { %16 = vsyncpa [#allocation6], 0 }
   0x4   :  { %18 = vsyncpa [#allocation6 + $0x1], 0 }
   0x5   :  { %19 = vsyncpa [#allocation11], 0  ;;  %s1643_s21 = smov 0   ;;  %s1645_s22 = smov 0  }
   0x6   :  { %s1647_s23 = smov 0   ;;  %s1649_s24 = smov 0  }
   0x7 LB: > { %s1664_s25 = sadd.s32 4294967295, %s1595_s24   ;;  %s1130_s26 = sadd.s32 4294967294, %s1595_s24   ;;  %s1595_s24 = sphi %s1649_s24, %s2028_s24   ;;  %s1591_s23 = sphi %s1647_s23, %s2027_s23   ;;  %s1587_s22 = sphi %s1645_s22, %s2026_s22   ;;  %s1583_s21 = sphi %s1643_s21, %s2025_s21  }
   0x8   : > { %p45_p0 = scmp.ne.s32.totalorder %s1587_s22, %s1583_s21  ;;  %p1994_p1 = scmp.eq.s32.totalorder %s1664_s25, 0 }
   0x9   : > { %p138_p3 = scmp.eq.s32.totalorder %s1130_s26, 1  ;;  %p1131_p5 = scmp.ge.s32.totalorder %s1595_s24, 1 }
   0xa   : > { %p1673_p4 = por %p1994_p1, %p45_p0  ;;  %p187_p7 = scmp.lt.s32.totalorder %s1595_s24, 3 }
   0xb   : > { %p1678_p6 = por %p138_p3, %p45_p0  ;;  %s1597_s30 = smov [#allocation7]  }
   0xc   : > { %s2000_s27 = scalar_select %p1673_p4, 1, 0 }
   0xd   : > { %s2001_s28 = scalar_select %p1678_p6, 1, 0 }
   0xe   : > { %p1684_p9 = pnand %p1131_p5, %p187_p7  ;;  %s199_s7 = sshll.u32 %s1597_s30, 4  ;;  %s200_s7 = int_to_ptr.vmem [resolvable:$true] %s199_s7 }
   0xf   : > { %s1698_s9 = sadd.s32 1, %s1595_s24   ;;  %s32_s10 = sadd.s32 1, %s1591_s23 }
  0x10   : > { %s2002_s29 = scalar_select %p1684_p9, 1, 0 }
  0x11   : > { %p1286_p10 = pneg %p1684_p9  ;;  %s29_s11 = ssub.s32 %s1595_s24, %s1698_s9 }
  0x12   : > { %s1432_s12 = scalar_lea.vmem %s200_s7, 4096  ;;  %p1440_p7 = scmp.lt.s32.totalorder %s200_s7, %s200_s7 }
  0x13   : > { %p1693_p12 = pnand %p1286_p10, %p1994_p1  ;;  %p1433_p0 = scmp.ne.s32.totalorder %s200_s7, %s1432_s12 }
  0x14   : > { %p1441_p8 = scmp.lt.s32.totalorder %s1432_s12, %s1432_s12 }
  0x15   : > { %p1423_p13 = pneg %p1693_p12 }
  0x16   : > { %p1442_p11 = por %p1441_p8, %p1440_p7 }
  0x17   : > { %p1435_p3 = pnand %p1433_p0, %p1423_p13 }
  0x19   : > { %p1436_p5 = pneg %p1435_p3 }
  0x1b   : > { %p1443_p2 = pnand %p1442_p11, %p1436_p5 }
  0x1d   : > { %1446 = shalt.err (!%p1443_p2)
}
  0x1e   : > { %s1995_s13 = smov 128   ;;  %s1996_s14 = smov 8  }
  0x1f   : > { %1289 = dma.hbm_to_vmem [thread:$0]  (!%p1693_p12), %s1988_s1, 4096, %s200_s7, [#allocation8], %s1995_s13, %s1995_s13, %s1996_s14  }
  0x20   : > { %p30_p2 = scmp.eq.s32.totalorder %s29_s11, 0  ;;  %p39_p8 = scmp.ne.s32.totalorder %s1591_s23, %s1587_s22 }
  0x21   : > { %p40_p10 = scmp.eq.s32.totalorder %s1595_s24, 0  ;;  %p1299_p11 = scmp.lt.s32.totalorder %s1595_s24, 2 }
  0x22   : > { %s1718_s17 = scalar_select %p30_p2, %s1591_s23, %s32_s10  }
  0x23   : > { %p41_p13 = por %p40_p10, %p39_p8  ;;  %p2004_p0 = scmp.eq.s32.totalorder %s1664_s25, 1 }
  0x24   : > { %s219_s19 = sand.u32 1, %s1591_s23   ;;  %s1219_s20 = sshll.u32 %s1595_s24, 11 }
  0x25   : > { %p1722_p3 = por %p2004_p0, %p39_p8  ;;  %s1134_s26 = sshll.u32 %s219_s19, 7 }
  0x26   : > { %s1731_s12 = scalar_lea.hbm %s1987_s0, %s1219_s20  ;;  %s223_s7 = scalar_lea.vmem [#allocation4], %s1134_s26 }
  0x27   : > { %s2005_s18 = scalar_select %p1722_p3, 1, 0 }
  0x28   : > { %s231_s10 = sshll.u32 %s223_s7, 4  ;;  %p1733_p12 = pnand %p1299_p11, %p41_p13  ;;  %s1737_s10 = int_to_ptr.vmem [resolvable:$true] %s231_s10 }
  0x29   : > { %s1739_s15 = scalar_lea.sflag [#allocation5], %s219_s19  ;;  %s1447_s16 = scalar_lea.hbm %s1731_s12, 2048 }
  0x2a   : > { %p1448_p5 = scmp.ne.s32.totalorder %s1731_s12, %s1447_s16  ;;  %p1449_p7 = pneg %p1733_p12 }
  0x2b   : > { %s1452_s26 = scalar_lea.hbm %s1987_s0, 4096  ;;  %p1453_p10 = scmp.lt.s32.totalorder %s1731_s12, %s1987_s0 }
  0x2c   : > { %p1450_p2 = pnand %p1449_p7, %p1448_p5  ;;  %p1454_p11 = scmp.lt.s32.totalorder %s1452_s26, %s1447_s16 }
  0x2e   : > { %p1451_p8 = pneg %p1450_p2  ;;  %p1455_p13 = por %p1454_p11, %p1453_p10 }
  0x30   : > { %p1456_p0 = pnand %p1455_p13, %p1451_p8 }
  0x32   : > { %1459 = shalt.err (!%p1456_p0)
}
  0x33   : > { %s1460_s19 = scalar_lea.vmem %s1737_s10, 2048  ;;  %s1600_s13 = smov [#allocation4]  }
  0x34   : > { %p1461_p1 = scmp.ne.s32.totalorder %s1737_s10, %s1460_s19  ;;  %s1465_s14 = sshll.u32 %s1600_s13, 4  ;;  %s1466_s14 = int_to_ptr.vmem [resolvable:$false] %s1465_s14 }
  0x35   : > { %s1467_s20 = scalar_lea.vmem %s1466_s14, 4096  ;;  %p1468_p2 = scmp.lt.s32.totalorder %s1737_s10, %s1466_s14 }
  0x36   : > { %p1463_p6 = pnand %p1461_p1, %p1449_p7  ;;  %p1469_p3 = scmp.lt.s32.totalorder %s1467_s20, %s1460_s19 }
  0x38   : > { %p1464_p5 = pneg %p1463_p6  ;;  %p1470_p4 = por %p1469_p3, %p1468_p2 }
  0x3a   : > { %p1471_p9 = pnand %p1470_p4, %p1464_p5 }
  0x3c   : > { %1474 = shalt.err (!%p1471_p9)
}
  0x3d   : > { %s2007_s16 = smov 8   ;;  %s2008_s30 = smov 128  }
  0x3e   : > { %1293 = dma.hbm_to_vmem [thread:$0]  (!%p1733_p12), %s1731_s12, 2048, %s1737_s10, %s1739_s15, %s2008_s30, %s2008_s30, %s2007_s16  }
  0x3f   : > { %p2009_p1 = scmp.ne.s32.totalorder %s2002_s29, 0 }
  0x40   : > { %s1766_s13 = sand.u32 (!%p2009_p1), 1, %s1587_s22   ;;  %p2010_p4 = scmp.ne.s32.totalorder (!%p2009_p1), %s2000_s27, 0 }
  0x41   : > { %243 = sbr.rel (%p2009_p1) target bundleno = 507 (0x1fb), region = 36  ;;  %s1139_s14 = sshll.u32 (!%p2009_p1), %s1766_s13, 7 }
  0x42   : > { %s246_s26 = scalar_lea.sflag (!%p2009_p1), [#allocation5], %s1766_s13  ;;  %s1770_s8 = scalar_lea.vmem (!%p2009_p1), [#allocation4], %s1139_s14 }
  0x46   : > { %1566 = dma.done.wait (%p2010_p4), %s246_s26, 2048  }
  0x47   : > { %1568 = vsyncadd (%p2010_p4), %s246_s26, 4294965248  ;;  %p2011_p6 = scmp.eq.s32.totalorder %s1664_s25, 0 }
  0x49   : > { %1570 = dma.done.wait (%p2011_p6), [#allocation8], 4096   ;;  %p2012_p9 = pmov %p2011_p6 }
  0x4a   : > { %s1780_s29 = scalar_lea.vmem [#allocation9], %s1139_s14  ;;  %p2013_p3 = scmp.ne.s32.totalorder %s1664_s25, 0 }
  0x4b   : > { %1572 = vsyncadd (%p2012_p9), [#allocation8], 4294963200 }
  0x4c   : > { %287 = sbr.rel (%p2013_p3) target bundleno = 85 (0x55), region = 48 }
  0x51   : > { %v288_v0 = vlaneseq  ;;  %v1601_v1 = vmov 0.0  }
  0x53   : > { %vm290_vm0 = vcmp.lt.s32.totalorder %v288_v0, 256 }
  0x54   : > { %292 = vst.msk [vmem:[#allocation2] sm:$0x3] %vm290_vm0, %v1601_v1  ;;  %293 = vst.msk [vmem:[#allocation3] sm:$0x3] %vm290_vm0, %v1601_v1 }
  0x55 PF: > { %v1347_v2 = vld [vmem:[#allocation7 + $0x74] ss:$8 sps:$4 sm:$0xff]   ;;  %v1349_v3 = vld [vmem:[#allocation7 + $0x70] ss:$8 sps:$4 sm:$0xff]   ;;  %v1350_v4 = vld [vmem:[#allocation7 + $0x64] ss:$8 sps:$4 sm:$0xff]  }
  0x56   : > { %582 = vmatprep.subr.bf16.mxu0 %v1347_v2  ;;  %1238 = vmatprep.subr.bf16.mxu1 %v1347_v2  ;;  %v1352_v5 = vld [vmem:[#allocation7 + $0x60] ss:$8 sps:$4 sm:$0xff]   ;;  %v1353_v6 = vld [vmem:[#allocation7 + $0x54] ss:$8 sps:$4 sm:$0xff]   ;;  %v1355_v7 = vld [vmem:[#allocation7 + $0x50] ss:$8 sps:$4 sm:$0xff]  }
  0x57   : > { %583 = vmatpush1.bf16.msra.mxu0 %v1349_v3  ;;  %1254 = vmatpush1.bf16.msra.mxu1 %v1349_v3  ;;  %v1356_v8 = vld [vmem:[#allocation7 + $0x44] ss:$8 sps:$4 sm:$0xff]   ;;  %v1358_v9 = vld [vmem:[#allocation7 + $0x40] ss:$8 sps:$4 sm:$0xff]   ;;  %v1359_v10 = vld [vmem:[#allocation7 + $0x34] ss:$8 sps:$4 sm:$0xff]  }
  0x58   : > { %584 = vmatprep.subr.bf16.mxu0 %v1350_v4  ;;  %1239 = vmatprep.subr.bf16.mxu1 %v1350_v4  ;;  %v1361_v11 = vld [vmem:[#allocation7 + $0x30] ss:$8 sps:$4 sm:$0xff]   ;;  %v1362_v12 = vld [vmem:[#allocation7 + $0x24] ss:$8 sps:$4 sm:$0xff]   ;;  %v1364_v13 = vld [vmem:[#allocation7 + $0x20] ss:$8 sps:$4 sm:$0xff]  }
  0x59   : > { %v1365_v14 = vld [vmem:[#allocation7 + $0x14] ss:$8 sps:$4 sm:$0xff]   ;;  %v1397_v15 = vld [vmem:[%s1770_s8 + $0x4] ss:$8 sps:$4 sm:$0xff]   ;;  %v1367_v16 = vld [vmem:[#allocation7 + $0x10] ss:$8 sps:$4 sm:$0xff]  }
  0x5a   : > { %v1368_v17 = vld [vmem:[#allocation7 + $0x4] ss:$8 sps:$4 sm:$0xff]   ;;  %614 = vmatprep.mubr.bf16.mxu0 %v1397_v15  ;;  %v1370_v19 = vld [vmem:[#allocation7] ss:$8 sps:$4 sm:$0xff]   ;;  %v1371_v20 = vld [vmem:[#allocation7 + $0xf4] ss:$8 sps:$4 sm:$0xff]  }
  0x5b   : > { %585 = vmatpush1.bf16.msra.mxu0 %v1352_v5  ;;  %1255 = vmatpush1.bf16.msra.mxu1 %v1352_v5  ;;  %v1403_v18 = vld [vmem:[%s1770_s8 + $0x44] ss:$8 sps:$4 sm:$0xff]   ;;  %v1373_v21 = vld [vmem:[#allocation7 + $0xf0] ss:$8 sps:$4 sm:$0xff]   ;;  %v1376_v23 = vld [vmem:[#allocation7 + $0xe0] ss:$8 sps:$4 sm:$0xff]  }
  0x5c   : > { %586 = vmatprep.subr.bf16.mxu0 %v1353_v6  ;;  %1240 = vmatprep.subr.bf16.mxu1 %v1353_v6  ;;  %v1374_v22 = vld [vmem:[#allocation7 + $0xe4] ss:$8 sps:$4 sm:$0xff]   ;;  %v1377_v24 = vld [vmem:[#allocation7 + $0xd4] ss:$8 sps:$4 sm:$0xff]   ;;  %v1379_v25 = vld [vmem:[#allocation7 + $0xd0] ss:$8 sps:$4 sm:$0xff]  }
  0x5d   : > { %654 = vmatprep.mubr.bf16.mxu1 %v1403_v18  ;;  %v1380_v26 = vld [vmem:[#allocation7 + $0xc4] ss:$8 sps:$4 sm:$0xff]   ;;  %v1382_v27 = vld [vmem:[#allocation7 + $0xc0] ss:$8 sps:$4 sm:$0xff]   ;;  %v1383_v28 = vld [vmem:[#allocation7 + $0xb4] ss:$8 sps:$4 sm:$0xff]  }
  0x5e   : > { %v1385_v29 = vld [vmem:[#allocation7 + $0xb0] ss:$8 sps:$4 sm:$0xff]   ;;  %v1386_v30 = vld [vmem:[#allocation7 + $0xa4] ss:$8 sps:$4 sm:$0xff]   ;;  %v1388_v31 = vld [vmem:[#allocation7 + $0xa0] ss:$8 sps:$4 sm:$0xff]  }
  0x5f   : > { %587 = vmatpush1.bf16.msra.mxu0 %v1355_v7  ;;  %1256 = vmatpush1.bf16.msra.mxu1 %v1355_v7  ;;  %v1389_v32 = vld [vmem:[#allocation7 + $0x94] ss:$8 sps:$4 sm:$0xff]   ;;  %v1391_v33 = vld [vmem:[#allocation7 + $0x90] ss:$8 sps:$4 sm:$0xff]   ;;  %v1392_v34 = vld [vmem:[#allocation7 + $0x84] ss:$8 sps:$4 sm:$0xff]  }
  0x60   : > { %588 = vmatprep.subr.bf16.mxu0 %v1356_v8  ;;  %1241 = vmatprep.subr.bf16.mxu1 %v1356_v8  ;;  %v1394_v35 = vld [vmem:[#allocation7 + $0x80] ss:$8 sps:$4 sm:$0xff]   ;;  %v1398_v38 = vld [vmem:[%s1770_s8 + $0x14] ss:$8 sps:$4 sm:$0xff]   ;;  %v1400_v40 = vld [vmem:[%s1770_s8 + $0x10] ss:$8 sps:$4 sm:$0xff]  }
  0x61   : > { %v1395_v36 = vld [vmem:[%s1770_s8] ss:$8 sps:$4 sm:$0xff]   ;;  %v1407_v39 = vld [vmem:[%s1770_s8 + $0x54] ss:$8 sps:$4 sm:$0xff]   ;;  %v1409_v41 = vld [vmem:[%s1770_s8 + $0x50] ss:$8 sps:$4 sm:$0xff]  }
  0x62   : > { %v1401_v37 = vld [vmem:[%s1770_s8 + $0x40] ss:$8 sps:$4 sm:$0xff]   ;;  %v1404_v42 = vld [vmem:[%s1770_s8 + $0x24] ss:$8 sps:$4 sm:$0xff]   ;;  %v1410_v46 = vld [vmem:[%s1770_s8 + $0x34] ss:$8 sps:$4 sm:$0xff]  }
  0x63   : > { %589 = vmatpush1.bf16.msra.mxu0 %v1358_v9  ;;  %1257 = vmatpush1.bf16.msra.mxu1 %v1358_v9  ;;  %v1413_v43 = vld [vmem:[%s1770_s8 + $0x64] ss:$8 sps:$4 sm:$0xff]   ;;  %v1406_v44 = vld [vmem:[%s1770_s8 + $0x20] ss:$8 sps:$4 sm:$0xff]   ;;  %v1416_v47 = vld [vmem:[%s1770_s8 + $0x74] ss:$8 sps:$4 sm:$0xff]  }
  0x64   : > { %590 = vmatprep.subr.bf16.mxu0 %v1359_v10  ;;  %1242 = vmatprep.subr.bf16.mxu1 %v1359_v10  ;;  %v1415_v45 = vld [vmem:[%s1770_s8 + $0x60] ss:$8 sps:$4 sm:$0xff]   ;;  %v1412_v48 = vld [vmem:[%s1770_s8 + $0x30] ss:$8 sps:$4 sm:$0xff]   ;;  %p1207_p12 = scmp.ne.s32.totalorder %s1664_s25, 1 }
  0x65   : > { %v1418_v49 = vld [vmem:[%s1770_s8 + $0x70] ss:$8 sps:$4 sm:$0xff]  }
  0x67   : > { %591 = vmatpush1.bf16.msra.mxu0 %v1361_v11  ;;  %1258 = vmatpush1.bf16.msra.mxu1 %v1361_v11 }
  0x68   : > { %592 = vmatprep.subr.bf16.mxu0 %v1362_v12  ;;  %1243 = vmatprep.subr.bf16.mxu1 %v1362_v12 }
  0x6b   : > { %593 = vmatpush1.bf16.msra.mxu0 %v1364_v13  ;;  %1259 = vmatpush1.bf16.msra.mxu1 %v1364_v13 }
  0x6c   : > { %594 = vmatprep.subr.bf16.mxu0 %v1365_v14  ;;  %1244 = vmatprep.subr.bf16.mxu1 %v1365_v14 }
  0x6f   : > { %595 = vmatpush1.bf16.msra.mxu0 %v1367_v16  ;;  %1260 = vmatpush1.bf16.msra.mxu1 %v1367_v16 }
  0x70   : > { %596 = vmatprep.subr.bf16.mxu0 %v1368_v17  ;;  %1245 = vmatprep.subr.bf16.mxu1 %v1368_v17 }
  0x73   : > { %597 = vmatpush1.bf16.msra.mxu0 %v1370_v19  ;;  %1261 = vmatpush1.bf16.msra.mxu1 %v1370_v19 }
  0x74   : > { %598 = vmatprep.subr.bf16.mxu0 %v1371_v20  ;;  %1246 = vmatprep.subr.bf16.mxu1 %v1371_v20 }
  0x77   : > { %599 = vmatpush2.bf16.msra.mxu0 %v1373_v21  ;;  %1262 = vmatpush2.bf16.msra.mxu1 %v1373_v21 }
  0x78   : > { %600 = vmatprep.subr.bf16.mxu0 %v1374_v22  ;;  %1247 = vmatprep.subr.bf16.mxu1 %v1374_v22 }
  0x7b   : > { %601 = vmatpush2.bf16.msra.mxu0 %v1376_v23  ;;  %1263 = vmatpush2.bf16.msra.mxu1 %v1376_v23 }
  0x7c   : > { %602 = vmatprep.subr.bf16.mxu0 %v1377_v24  ;;  %1248 = vmatprep.subr.bf16.mxu1 %v1377_v24 }
  0x7f   : > { %603 = vmatpush2.bf16.msra.mxu0 %v1379_v25  ;;  %1264 = vmatpush2.bf16.msra.mxu1 %v1379_v25 }
  0x80   : > { %604 = vmatprep.subr.bf16.mxu0 %v1380_v26  ;;  %1249 = vmatprep.subr.bf16.mxu1 %v1380_v26 }
  0x83   : > { %605 = vmatpush2.bf16.msra.mxu0 %v1382_v27  ;;  %1265 = vmatpush2.bf16.msra.mxu1 %v1382_v27 }
  0x84   : > { %606 = vmatprep.subr.bf16.mxu0 %v1383_v28  ;;  %1250 = vmatprep.subr.bf16.mxu1 %v1383_v28 }
  0x87   : > { %607 = vmatpush2.bf16.msra.mxu0 %v1385_v29  ;;  %1266 = vmatpush2.bf16.msra.mxu1 %v1385_v29 }
  0x88   : > { %608 = vmatprep.subr.bf16.mxu0 %v1386_v30  ;;  %1251 = vmatprep.subr.bf16.mxu1 %v1386_v30 }
  0x8b   : > { %609 = vmatpush2.bf16.msra.mxu0 %v1388_v31  ;;  %1267 = vmatpush2.bf16.msra.mxu1 %v1388_v31 }
  0x8c   : > { %610 = vmatprep.subr.bf16.mxu0 %v1389_v32  ;;  %1252 = vmatprep.subr.bf16.mxu1 %v1389_v32 }
  0x8f   : > { %611 = vmatpush2.bf16.msra.mxu0 %v1391_v33  ;;  %1268 = vmatpush2.bf16.msra.mxu1 %v1391_v33 }
  0x90   : > { %612 = vmatprep.subr.bf16.mxu0 %v1392_v34  ;;  %1253 = vmatprep.subr.bf16.mxu1 %v1392_v34 }
  0x93   : > { %613 = vmatpush2.bf16.msra.mxu0 %v1394_v35  ;;  %1269 = vmatpush2.bf16.msra.mxu1 %v1394_v35 }
  0x96   : > { %615 = vmatmul.mubr.bf16.vlgmr.msra.gmra.mxu0 %v1395_v36  ;;  %655 = vmatmul.mubr.bf16.vlgmr.msra.gmra.mxu1 %v1401_v37 }
  0x97   : > { %624 = vmatprep.mubr.bf16.mxu0 %v1398_v38  ;;  %664 = vmatprep.mubr.bf16.mxu1 %v1407_v39 }
  0x9e   : > { %625 = vmatmul.mubr.bf16.gmra.mxu0 %v1400_v40  ;;  %665 = vmatmul.mubr.bf16.gmra.mxu1 %v1409_v41 }
  0x9f   : > { %634 = vmatprep.mubr.bf16.mxu0 %v1404_v42  ;;  %674 = vmatprep.mubr.bf16.mxu1 %v1413_v43 }
  0xa6   : > { %635 = vmatmul.mubr.bf16.gmra.mxu0 %v1406_v44  ;;  %675 = vmatmul.mubr.bf16.gmra.mxu1 %v1415_v45 }
  0xa7   : > { %644 = vmatprep.mubr.bf16.mxu0 %v1410_v46  ;;  %684 = vmatprep.mubr.bf16.mxu1 %v1416_v47 }
  0xae   : > { %645 = vmatmul.mubr.bf16.gmra.mxu0 %v1412_v48  ;;  %685 = vmatmul.mubr.bf16.gmra.mxu1 %v1418_v49 }
 0x156   : > { %v616_v50 = vpop.f32.mrf.mxu0  ;;  %v1800_v51 = vpop.f32.mrf.mxu1 }
 0x157   : > { %v763_v11 = vmul.f32 %v616_v50, %v616_v50 }
 0x158   : > { %v618_v52 = vpop.f32.mrf.mxu0  ;;  %v1802_v53 = vpop.f32.mrf.mxu1 }
 0x159   : > { %v1220_v54 = vpack.c.bf16 %v618_v52, %v616_v50  ;;  %v1228_v55 = vpack.c.bf16 %v1802_v53, %v1800_v51  ;;  %v764_v16 = vmul.f32 %v618_v52, %v618_v52 }
 0x15a   : > { %v620_v56 = vpop.f32.mrf.mxu0  ;;  %v1806_v57 = vpop.f32.mrf.mxu1 }
 0x15b   : > { %953 = vst [vmem:[%s1780_s29] sm:$0xff] %v1220_v54  ;;  %961 = vst [vmem:[%s1780_s29 + $0x40] sm:$0xff] %v1228_v55  ;;  %v765_v6 = vmul.f32 %v620_v56, %v620_v56  ;;  %v696_v17 = vadd.f32 %v620_v56, %v616_v50 }
 0x15c   : > { %v622_v58 = vpop.f32.mrf.mxu0  ;;  %v1810_v59 = vpop.f32.mrf.mxu1 }
 0x15d   : > { %v1221_v60 = vpack.c.bf16 %v622_v58, %v620_v56  ;;  %v1229_v62 = vpack.c.bf16 %v1810_v59, %v1806_v57  ;;  %v766_v9 = vmul.f32 %v622_v58, %v622_v58  ;;  %v795_v18 = vadd.f32 %v765_v6, %v763_v11 }
 0x15e   : > { %v626_v61 = vpop.f32.mrf.mxu0  ;;  %v1814_v63 = vpop.f32.mrf.mxu1  ;;  %v717_v23 = vadd.f32 %v622_v58, %v618_v52 }
 0x15f   : > { %954 = vst [vmem:[%s1780_s29 + $0x8] sm:$0xff] %v1221_v60  ;;  %962 = vst [vmem:[%s1780_s29 + $0x48] sm:$0xff] %v1229_v62  ;;  %v767_v12 = vmul.f32 %v626_v61, %v626_v61  ;;  %v816_v24 = vadd.f32 %v766_v9, %v764_v16  ;;  %v697_v25 = vadd.f32 %v696_v17, %v626_v61 }
 0x160   : > { %v628_v0 = vpop.f32.mrf.mxu0  ;;  %v1818_v1 = vpop.f32.mrf.mxu1 }
 0x161   : > { %v1222_v2 = vpack.c.bf16 %v628_v0, %v626_v61  ;;  %v1230_v4 = vpack.c.bf16 %v1818_v1, %v1814_v63  ;;  %v768_v19 = vmul.f32 %v628_v0, %v628_v0  ;;  %v796_v27 = vadd.f32 %v795_v18, %v767_v12 }
 0x162   : > { %v630_v3 = vpop.f32.mrf.mxu0  ;;  %v1822_v5 = vpop.f32.mrf.mxu1  ;;  %v718_v33 = vadd.f32 %v717_v23, %v628_v0  ;;  %v780_v23 = vmul.f32 %v1802_v53, %v1802_v53 }
 0x163   : > { %955 = vst [vmem:[%s1780_s29 + $0x10] sm:$0xff] %v1222_v2  ;;  %963 = vst [vmem:[%s1780_s29 + $0x50] sm:$0xff] %v1230_v4  ;;  %v769_v20 = vmul.f32 %v630_v3, %v630_v3  ;;  %v698_v34 = vadd.f32 %v697_v25, %v630_v3  ;;  %v817_v35 = vadd.f32 %v816_v24, %v768_v19 }
 0x164   : > { %v632_v7 = vpop.f32.mrf.mxu0  ;;  %v1826_v8 = vpop.f32.mrf.mxu1  ;;  %v781_v24 = vmul.f32 %v1806_v57, %v1806_v57 }
 0x165   : > { %v1223_v10 = vpack.c.bf16 %v632_v7, %v630_v3  ;;  %v1231_v14 = vpack.c.bf16 %v1826_v8, %v1822_v5  ;;  %v770_v28 = vmul.f32 %v632_v7, %v632_v7  ;;  %v797_v36 = vadd.f32 %v796_v27, %v769_v20 }
 0x166   : > { %v636_v13 = vpop.f32.mrf.mxu0  ;;  %v1830_v15 = vpop.f32.mrf.mxu1  ;;  %v719_v41 = vadd.f32 %v718_v33, %v632_v7 }
 0x167   : > { %956 = vst [vmem:[%s1780_s29 + $0x18] sm:$0xff] %v1223_v10  ;;  %964 = vst [vmem:[%s1780_s29 + $0x58] sm:$0xff] %v1231_v14  ;;  %v771_v29 = vmul.f32 %v636_v13, %v636_v13  ;;  %v699_v42 = vadd.f32 %v698_v34, %v636_v13  ;;  %v818_v44 = vadd.f32 %v817_v35, %v770_v28 }
 0x168   : > { %v638_v21 = vpop.f32.mrf.mxu0  ;;  %v1834_v22 = vpop.f32.mrf.mxu1 }
 0x169   : > { %v1224_v26 = vpack.c.bf16 %v638_v21, %v636_v13  ;;  %v1232_v31 = vpack.c.bf16 %v1834_v22, %v1830_v15  ;;  %v772_v37 = vmul.f32 %v638_v21, %v638_v21  ;;  %v798_v45 = vadd.f32 %v797_v36, %v771_v29 }
 0x16a   : > { %v640_v30 = vpop.f32.mrf.mxu0  ;;  %v1838_v32 = vpop.f32.mrf.mxu1  ;;  %v720_v50 = vadd.f32 %v719_v41, %v638_v21  ;;  %v779_v13 = vmul.f32 %v1800_v51, %v1800_v51 }
 0x16b   : > { %957 = vst [vmem:[%s1780_s29 + $0x20] sm:$0xff] %v1224_v26  ;;  %v773_v38 = vmul.f32 %v640_v30, %v640_v30  ;;  %965 = vst [vmem:[%s1780_s29 + $0x60] sm:$0xff] %v1232_v31  ;;  %v700_v52 = vadd.f32 %v699_v42, %v640_v30  ;;  %v819_v55 = vadd.f32 %v818_v44, %v772_v37 }
 0x16c   : > { %v642_v39 = vpop.f32.mrf.mxu0  ;;  %v1842_v40 = vpop.f32.mrf.mxu1  ;;  %v783_v31 = vmul.f32 %v1814_v63, %v1814_v63  ;;  %v786_v42 = vmul.f32 %v1826_v8, %v1826_v8 }
 0x16d   : > { %v1225_v43 = vpack.c.bf16 %v642_v39, %v640_v30  ;;  %v774_v46 = vmul.f32 %v642_v39, %v642_v39  ;;  %v1233_v48 = vpack.c.bf16 %v1842_v40, %v1838_v32  ;;  %v799_v56 = vadd.f32 %v798_v45, %v773_v38 }
 0x16e   : > { %v646_v47 = vpop.f32.mrf.mxu0  ;;  %v1846_v49 = vpop.f32.mrf.mxu1  ;;  %v721_v61 = vadd.f32 %v720_v50, %v642_v39 }
 0x16f   : > { %958 = vst [vmem:[%s1780_s29 + $0x28] sm:$0xff] %v1225_v43  ;;  %v775_v54 = vmul.f32 %v646_v47, %v646_v47  ;;  %966 = vst [vmem:[%s1780_s29 + $0x68] sm:$0xff] %v1233_v48  ;;  %v701_v62 = vadd.f32 %v700_v52, %v646_v47  ;;  %v820_v3 = vadd.f32 %v819_v55, %v774_v46 }
 0x170   : > { %v648_v58 = vpop.f32.mrf.mxu0  ;;  %v1850_v60 = vpop.f32.mrf.mxu1  ;;  %v788_v46 = vmul.f32 %v1834_v22, %v1834_v22  ;;  %v790_v52 = vmul.f32 %v1842_v40, %v1842_v40 }
 0x171   : > { %v776_v0 = vmul.f32 %v648_v58, %v648_v58  ;;  %v1226_v2 = vpack.c.bf16 %v648_v58, %v646_v47  ;;  %v1234_v6 = vpack.c.bf16 %v1850_v60, %v1846_v49  ;;  %v800_v9 = vadd.f32 %v799_v56, %v775_v54 }
 0x172   : > { %v650_v4 = vpop.f32.mrf.mxu0  ;;  %v690_v7 = vpop.f32.mrf.mxu1  ;;  %v722_v10 = vadd.f32 %v721_v61, %v648_v58  ;;  %v792_v58 = vmul.f32 %v1850_v60, %v1850_v60 }
 0x173   : > { %959 = vst [vmem:[%s1780_s29 + $0x30] sm:$0xff] %v1226_v2  ;;  %v702_v11 = vadd.f32 %v701_v62, %v650_v4  ;;  %v777_v12 = vmul.f32 %v650_v4, %v650_v4  ;;  %v821_v14 = vadd.f32 %v820_v3, %v776_v0  ;;  %967 = vst [vmem:[%s1780_s29 + $0x70] sm:$0xff] %v1234_v6 }
 0x174   : > { %v652_v16 = vpop.f32.mrf.mxu0  ;;  %v692_v17 = vpop.f32.mrf.mxu1 }
 0x175   : > { %v703_v18 = vadd.f32 %v702_v11, %v1800_v51  ;;  %v801_v19 = vadd.f32 %v800_v9, %v777_v12  ;;  %v723_v20 = vadd.f32 %v722_v10, %v652_v16  ;;  %v778_v21 = vmul.f32 %v652_v16, %v652_v16 }
 0x176   : > { %v1227_v25 = vpack.c.bf16 %v652_v16, %v650_v4  ;;  %v1235_v26 = vpack.c.bf16 %v692_v17, %v690_v7  ;;  %v782_v51 = vmul.f32 %v1810_v59, %v1810_v59  ;;  %v794_v2 = vmul.f32 %v692_v17, %v692_v17 }
 0x177   : > { %v704_v27 = vadd.f32 %v703_v18, %v1806_v57  ;;  %v802_v28 = vadd.f32 %v801_v19, %v779_v13  ;;  %v724_v29 = vadd.f32 %v723_v20, %v1802_v53  ;;  %v822_v30 = vadd.f32 %v821_v14, %v778_v21 }
 0x178   : > { %960 = vst [vmem:[%s1780_s29 + $0x38] sm:$0xff] %v1227_v25  ;;  %968 = vst [vmem:[%s1780_s29 + $0x78] sm:$0xff] %v1235_v26  ;;  %v784_v57 = vmul.f32 %v1818_v1, %v1818_v1  ;;  %v785_v53 = vmul.f32 %v1822_v5, %v1822_v5  ;;  %v1602_v13 = vmov 1966171168   ;;  %v744_v14 = vlaneseq }
 0x179   : > { %v803_v33 = vadd.f32 %v802_v28, %v781_v24  ;;  %v725_v34 = vadd.f32 %v724_v29, %v1810_v59  ;;  %v823_v35 = vadd.f32 %v822_v30, %v780_v23  ;;  %v705_v36 = vadd.f32 %v704_v27, %v1814_v63 }
 0x17a   : > { %v787_v59 = vmul.f32 %v1830_v15, %v1830_v15  ;;  %v745_v25 = vshrl.u32 %v744_v14, 7  ;;  %vm1900_vm1 = vcmp.lt.s32.totalorder %v744_v14, 256 }
 0x17b   : > { %v726_v37 = vadd.f32 %v725_v34, %v1818_v1  ;;  %v824_v38 = vadd.f32 %v823_v35, %v782_v51  ;;  %v706_v39 = vadd.f32 %v705_v36, %v1822_v5  ;;  %v804_v41 = vadd.f32 %v803_v33, %v783_v31 }
 0x17c   : > { %v789_v1 = vmul.f32 %v1838_v32, %v1838_v32 }
 0x17d   : > { %v825_v43 = vadd.f32 %v824_v38, %v784_v57  ;;  %v707_v63 = vadd.f32 %v706_v39, %v1830_v15  ;;  %v805_v44 = vadd.f32 %v804_v41, %v785_v53  ;;  %v727_v45 = vadd.f32 %v726_v37, %v1826_v8  ;;  %v695_v39 = vld [vmem:[#allocation2] sm:$0x3] }
 0x17e   : > { %v791_v15 = vmul.f32 %v1846_v49, %v1846_v49 }
 0x17f   : > { %v708_v5 = vadd.f32 %v707_v63, %v1838_v32  ;;  %v806_v47 = vadd.f32 %v805_v44, %v787_v59  ;;  %v728_v48 = vadd.f32 %v727_v45, %v1834_v22  ;;  %v826_v50 = vadd.f32 %v825_v43, %v786_v42  ;;  %v762_v43 = vld [vmem:[#allocation3] sm:$0x3] }
 0x180   : > { %v793_v32 = vmul.f32 %v690_v7, %v690_v7 }
 0x181   : > { %v807_v54 = vadd.f32 %v806_v47, %v789_v1  ;;  %v729_v8 = vadd.f32 %v728_v48, %v1842_v40  ;;  %v827_v55 = vadd.f32 %v826_v50, %v788_v46  ;;  %v709_v56 = vadd.f32 %v708_v5, %v1846_v49 }
 0x182   : > { %v742_v49 = vunpack.c.l.s4 %v1602_v13 }
 0x183   : > { %v828_v61 = vadd.f32 %v827_v55, %v790_v52  ;;  %v808_v62 = vadd.f32 %v807_v54, %v791_v15  ;;  %v730_v22 = vadd.f32 %v729_v8, %v1850_v60  ;;  %v710_v0 = vadd.f32 %v709_v56, %v690_v7 }
 0x184   : > { %v743_v24 = vunpack.c.0.s8 %v742_v49 }
 0x185   : > { %v829_v3 = vadd.f32 %v828_v61, %v792_v58  ;;  %v711_v4 = vrot.slane %v710_v0, 4  ;;  %v809_v6 = vadd.f32 %v808_v62, %v793_v32  ;;  %v731_v9 = vadd.f32 %v730_v22, %v692_v17 }
 0x186   : > { %v746_v34 = vsub.s32 %v743_v24, %v745_v25 }
 0x187   : > { %v712_v10 = vadd.f32 %v711_v4, %v710_v0  ;;  %v810_v11 = vrot.slane %v809_v6, 4  ;;  %v732_v40 = vrot.slane %v731_v9, 4  ;;  %v830_v12 = vadd.f32 %v829_v3, %v794_v2 }
 0x189   : > { %v713_v16 = vrot.slane %v712_v10, 2  ;;  %v811_v18 = vadd.f32 %v810_v11, %v809_v6  ;;  %v733_v19 = vadd.f32 %v732_v40, %v731_v9  ;;  %v831_v20 = vrot.slane %v830_v12, 4 }
 0x18b   : > { %v714_v21 = vadd.f32 %v713_v16, %v712_v10  ;;  %v812_v23 = vrot.slane %v811_v18, 2  ;;  %v734_v60 = vrot.slane %v733_v19, 2  ;;  %v832_v7 = vadd.f32 %v831_v20, %v830_v12 }
 0x18d   : > { %v715_v26 = vrot.slane %v714_v21, 1  ;;  %v813_v27 = vadd.f32 %v812_v23, %v811_v18  ;;  %v735_v17 = vadd.f32 %v734_v60, %v733_v19  ;;  %v833_v28 = vrot.slane %v832_v7, 2 }
 0x18f   : > { %v814_v29 = vrot.slane %v813_v27, 1  ;;  %v736_v30 = vrot.slane %v735_v17, 1  ;;  %v834_v51 = vadd.f32 %v833_v28, %v832_v7  ;;  %v716_v31 = vadd.f32 %v715_v26, %v714_v21 }
 0x191   : > { %v737_v33 = vadd.f32 %v736_v30, %v735_v17  ;;  %v835_v35 = vrot.slane %v834_v51, 1  ;;  %v815_v36 = vadd.f32 %v814_v29, %v813_v27 }
 0x193   : > { %v740_v57 = vcombine.low %v716_v31, %v737_v33  ;;  %v836_v53 = vadd.f32 %v835_v35, %v834_v51 }
 0x195   : > { %v747_v37 = vrot.slane %v740_v57, %v746_v34  ;;  %v839_v38 = vcombine.low %v815_v36, %v836_v53 }
 0x197   : > { %v754_v41 = vrot.slane %v747_v37, %v746_v34  ;;  %v846_v42 = vrot.slane %v839_v38, %v746_v34 }
 0x199   : > { %v756_v63 = vadd.f32 %v754_v41, %v695_v39  ;;  %v853_v44 = vrot.slane %v846_v42, %v746_v34  ;;  %972 = sbr.rel (%p1207_p12) target bundleno = 450 (0x1c2), region = 52 }
 0x19b   : > { %761 = vst.msk [vmem:[#allocation2] sm:$0x3] %vm1900_vm1, %v756_v63  ;;  %v855_v45 = vadd.f32 %v853_v44, %v762_v43 }
 0x19d   : > { %856 = vst.msk [vmem:[#allocation3] sm:$0x3] %vm1900_vm1, %v855_v45 }
 0x19e   : > { %v980_v54 = vld [vmem:[%s1989_s2] sm:$0x3] }
 0x19f   : > { %v985_v56 = vld [vmem:[%s1990_s3] sm:$0x3] }
 0x1a2   : > { %v973_v46 = vld [vmem:[#allocation2] sm:$0x3] }
 0x1a3   : > { %v974_v5 = vmul.f32 0.005, %v973_v46 }
 0x1a4   : > { %v975_v1 = vld [vmem:[#allocation3] sm:$0x3] }
 0x1a5   : > { %v976_v47 = vmul.f32 0.005, %v975_v1  ;;  %v977_v48 = vmul.f32 %v974_v5, %v974_v5 }
 0x1a7   : > { %v978_v50 = vsub.f32 %v976_v47, %v977_v48 }
 0x1a9   : > { %v979_v52 = vmax.f32 %v978_v50, 0.0 }
 0x1ab   : > { %v981_v15 = vadd.f32 1e-05, %v979_v52 }
 0x1ad   : > { %1419 = vrsqrt.f32 %v981_v15 }
 0x1ba   : > { %v1420_v8 = vpop.eup %1419 }
 0x1bb   : > { %v983_v55 = vmul.f32 %v1420_v8, %v980_v54 }
 0x1bd   : > { %984 = vst.msk [vmem:[#allocation10] sm:$0x3] %vm1900_vm1, %v983_v55  ;;  %v986_v58 = vmul.f32 %v983_v55, %v974_v5 }
 0x1bf   : > { %v987_v32 = vsub.f32 %v985_v56, %v986_v58 }
 0x1c1   : > { %988 = vst.msk [vmem:[#allocation12] sm:$0x3] %vm1900_vm1, %v987_v32 }
 0x1c2 PF: > { %s1603_s15 = smov [#allocation10]   ;;  %s1237_s19 = sshll.u32 %s1664_s25, 11 }
 0x1c3   : > { %s1018_s7 = sshll.u32 %s1603_s15, 4  ;;  %s1923_s30 = scalar_lea.hbm %s1991_s4, %s1237_s19  ;;  %s1019_s7 = int_to_ptr.vmem [resolvable:$true] %s1018_s7 }
 0x1c4   : > { %s1475_s14 = scalar_lea.vmem %s1019_s7, 32  ;;  %p2016_p8 = scmp.eq.s32.totalorder %s1664_s25, 1 }
 0x1c5   : > { %p1476_p7 = scmp.ne.s32.totalorder %s1019_s7, %s1475_s14  ;;  %p1482_p13 = scmp.lt.s32.totalorder %s1019_s7, %s1019_s7 }
 0x1c6   : > { %p1483_p0 = scmp.lt.s32.totalorder %s1475_s14, %s1475_s14 }
 0x1c7   : > { %p1477_p10 = pnand %p1476_p7, %p2016_p8 }
 0x1c8   : > { %p1484_p5 = por %p1483_p0, %p1482_p13 }
 0x1c9   : > { %p1478_p11 = pneg %p1477_p10 }
 0x1cb   : > { %p1485_p2 = pnand %p1484_p5, %p1478_p11 }
 0x1cd   : > { %1488 = shalt.err (!%p1485_p2)
}
 0x1ce   : > { %p2017_p1 = pmov %p2016_p8  ;;  %s1004_s27 = sshll.u32 %s1780_s29, 4  ;;  %s1933_s27 = int_to_ptr.vmem [resolvable:$true] %s1004_s27 }
 0x1cf   : > { %s990_s12 = scalar_lea.sflag [#allocation6], %s1766_s13  ;;  %s1499_s10 = scalar_lea.vmem %s1933_s27, 2048 }
 0x1d0   : > { %1278 = dma.vmem_to_hbm [thread:$0]  (%p2017_p1), %s1019_s7, 32, %s1992_s5, [#allocation11]  }
 0x1d1   : > { %p1500_p4 = scmp.ne.s32.totalorder %s1933_s27, %s1499_s10  ;;  %p2018_p6 = scmp.ne.s32.totalorder %s2005_s18, 0 }
 0x1d2   : > { %s1604_s11 = smov [#allocation9]  }
 0x1d3   : > { %p1501_p9 = pnand %p1500_p4, %p2018_p6  ;;  %s1503_s15 = sshll.u32 %s1604_s11, 4  ;;  %s1504_s15 = int_to_ptr.vmem [resolvable:$false] %s1503_s15 }
 0x1d4   : > { %s1505_s19 = scalar_lea.vmem %s1504_s15, 4096  ;;  %p1506_p12 = scmp.lt.s32.totalorder %s1933_s27, %s1504_s15 }
 0x1d5   : > { %p1502_p3 = pneg %p1501_p9  ;;  %p1507_p7 = scmp.lt.s32.totalorder %s1505_s19, %s1499_s10 }
 0x1d7   : > { %p1508_p8 = por %p1507_p7, %p1506_p12 }
 0x1d9   : > { %p1509_p10 = pnand %p1508_p8, %p1502_p3 }
 0x1db   : > { %1512 = shalt.err (!%p1509_p10)
}
 0x1dc   : > { %s1513_s29 = scalar_lea.hbm %s1923_s30, 2048  ;;  %s1517_s16 = scalar_lea.hbm %s1991_s4, 4096 }
 0x1dd   : > { %p1514_p11 = scmp.ne.s32.totalorder %s1923_s30, %s1513_s29  ;;  %p1518_p5 = scmp.lt.s32.totalorder %s1923_s30, %s1991_s4 }
 0x1de   : > { %p1519_p2 = scmp.lt.s32.totalorder %s1517_s16, %s1513_s29 }
 0x1df   : > { %p1515_p13 = pnand %p1514_p11, %p2018_p6 }
 0x1e0   : > { %p1520_p1 = por %p1519_p2, %p1518_p5 }
 0x1e1   : > { %p1516_p0 = pneg %p1515_p13 }
 0x1e3   : > { %p1521_p4 = pnand %p1520_p1, %p1516_p0 }
 0x1e5   : > { %1524 = shalt.err (!%p1521_p4)
}
 0x1e6   : > { %s1605_s8 = smov 128   ;;  %s1606_s10 = smov 8  }
 0x1e7   : > { %1276 = dma.vmem_to_hbm [thread:$0]  (%p2018_p6), %s1933_s27, 2048, %s1923_s30, %s990_s12, %s1605_s8, %s1605_s8, %s1606_s10  }
 0x1e8   : > { %s1607_s11 = smov [#allocation12]   ;;  %p2019_p3 = scmp.eq.s32.totalorder %s1664_s25, 1 }
 0x1e9   : > { %s1029_s15 = sshll.u32 %s1607_s11, 4  ;;  %s1030_s15 = int_to_ptr.vmem [resolvable:$true] %s1029_s15 }
 0x1ea   : > { %s1525_s19 = scalar_lea.vmem %s1030_s15, 32  ;;  %p1532_p8 = scmp.lt.s32.totalorder %s1030_s15, %s1030_s15 }
 0x1eb   : > { %p1526_p9 = scmp.ne.s32.totalorder %s1030_s15, %s1525_s19  ;;  %p1533_p10 = scmp.lt.s32.totalorder %s1525_s19, %s1525_s19 }
 0x1ed   : > { %p1527_p12 = pnand %p1526_p9, %p2019_p3  ;;  %p1534_p11 = por %p1533_p10, %p1532_p8 }
 0x1ef   : > { %p1528_p7 = pneg %p1527_p12 }
 0x1f1   : > { %p1535_p13 = pnand %p1534_p11, %p1528_p7 }
 0x1f3   : > { %1538 = shalt.err (!%p1535_p13)
}
 0x1f4   : > { %p2020_p0 = pmov %p2019_p3 }
 0x1f6   : > { %1280 = dma.vmem_to_hbm [thread:$0]  (%p2020_p0), %s1030_s15, 32, %s1993_s6, [#allocation11]  }
 0x1f7   : > { %p2021_p6 = pmov %p2020_p0 }
 0x1f8   : > { %p2022_p5 = pmov %p2020_p0 }
 0x1f9   : > { %1574 = dma.done.wait (%p2021_p6), [#allocation11], 64  }
 0x1fa   : > { %1576 = vsyncadd (%p2022_p5), [#allocation11], 4294967232 }
 0x1fb PF: > { %s1049_s18 = sand.u32 1, %s1583_s21   ;;  %p2023_p2 = scmp.ne.s32.totalorder %s2001_s28, 0 }
 0x1fc   : > { %p2024_p1 = scmp.ge.s32.totalorder %s1595_s24, 2  ;;  %s1050_s13 = scalar_lea.sflag [#allocation6], %s1049_s18 }
 0x1fe   : > { %p1295_p4 = pnand %p2024_p1, %p2023_p2 }
 0x200   : > { %p1296_p9 = pneg %p1295_p4 }
 0x202   : > { %1578 = dma.done.wait (%p1296_p9), %s1050_s13, 2048  }
 0x203   : > { %1580 = vsyncadd (%p1296_p9), %s1050_s13, 4294965248  ;;  %p22_p3 = scmp.ge.s32.totalorder %s1698_s9, 4   ;;  %s2025_s21 = smov %s1587_s22 }
 0x204   : > { %s2026_s22 = smov %s1591_s23  ;;  %s2027_s23 = smov %s1718_s17 }
 0x205   : > { %s2028_s24 = smov %s1698_s9  ;;  %24 = sbr.rel (!%p22_p3) target bundleno = 7 (0x7), region = 109 }
 0x20a   :  { %1055 = vsyncpa [#allocation5], 1 }
 0x20b   :  { %1057 = vsyncpa [#allocation5 + $0x1], 1 }
 0x20c   :  { %1058 = vsyncpa [#allocation8], 1 }
 0x20d   :  { %1059 = vsyncpa [#allocation6], 1 }
 0x20e   :  { %1061 = vsyncpa [#allocation6 + $0x1], 1 }
 0x20f   :  { %1062 = vsyncpa [#allocation11], 1 }

</bundles_post_ra>
